<compile_context>
chip_gen: v5e
topology: v5e:2x2
jax: 0.10.0
libtpu: 0.0.40
codegen_flags: <defaults>
</compile_context>

<pallas_src>
import jax
import jax.numpy as jnp
from jax.experimental import pallas as pl
from jax.experimental.pallas import tpu as pltpu


def ffm_kernel(xs_ref, xts_ref, out_ref, acc_ref):
    l = pl.program_id(1)

    @pl.when(l == 0)
    def _():
        acc_ref[...] = jnp.zeros_like(acc_ref)

    prod = xs_ref[...].astype(jnp.float32) * xts_ref[...].astype(jnp.float32)
    acc_ref[...] += jnp.sum(prod, axis=0, keepdims=True)

    @pl.when(l == pl.num_programs(1) - 1)
    def _():
        out_ref[...] = acc_ref[...]


def ffm_forward(feature_embeddings, weights_first_order, fm_bias,
                feature_idx, feature_values, *,
                block_b=1024, block_l=2048, stream_dtype=jnp.bfloat16):
    B, F = feature_idx.shape
    E = feature_embeddings.shape[-1]

    vals = feature_values.astype(jnp.float32)                       # (B, F)
    emb = feature_embeddings.astype(jnp.float32)                    # (S, F, E)

    # --- glue: data-dependent gathers stay in plain JAX (fused by XLA) ---
    pairs = [(i, j) for i in range(F) for j in range(i + 1, F)]
    P = len(pairs)
    if P > 0:
        ii = jnp.array([p[0] for p in pairs], dtype=jnp.int32)      # (P,)
        jj = jnp.array([p[1] for p in pairs], dtype=jnp.int32)      # (P,)
        a = emb[feature_idx[:, ii], jj, :] * vals[:, ii, None]      # (B, P, E)
        c = emb[feature_idx[:, jj], ii, :] * vals[:, jj, None]      # (B, P, E)
        a = a.reshape(B, P * E)
        c = c.reshape(B, P * E)
    else:
        a = jnp.zeros((B, 0), jnp.float32)
        c = jnp.zeros((B, 0), jnp.float32)

    w1 = weights_first_order[feature_idx, 0].astype(jnp.float32)    # (B, F)

    # Fused first+second order streams, transposed so batch -> lanes.
    xs = jnp.concatenate([a, vals], axis=1).T                       # (L, B)
    xts = jnp.concatenate([c, w1], axis=1).T                        # (L, B)
    L = P * E + F

    # --- tiling ---
    blk_b = max(128, (block_b // 128) * 128)
    blk_b = min(blk_b, pl.cdiv(B, 128) * 128)     # don't over-pad tiny batches
    # keep >=2 batch grid steps when possible (feeds both v7x TensorCores)
    if pl.cdiv(B, 128) * 128 >= 2 * 128 and blk_b > (pl.cdiv(B, 128) * 128) // 2:
        blk_b = max(128, ((pl.cdiv(B, 128) * 128) // 2 // 128) * 128)
    Bp = pl.cdiv(B, blk_b) * blk_b

    blk_l = max(8, (block_l // 8) * 8)
    blk_l = min(blk_l, pl.cdiv(L, 8) * 8)
    Lp = pl.cdiv(L, blk_l) * blk_l

    xs = jnp.pad(xs, ((0, Lp - L), (0, Bp - B))).astype(stream_dtype)
    xts = jnp.pad(xts, ((0, Lp - L), (0, Bp - B))).astype(stream_dtype)

    # 2 streams x 2 pipeline buffers per grid step (+ small out/acc tiles).
    itemsize = xs.dtype.itemsize
    vmem_need = 4 * blk_l * blk_b * itemsize + 8 * blk_b * 4
    vmem_limit = int(min(max(2 * vmem_need, 32 * 1024 * 1024), 56 * 1024 * 1024))

    out = pl.pallas_call(
        ffm_kernel,
        out_shape=jax.ShapeDtypeStruct((1, Bp), jnp.float32),
        grid=(Bp // blk_b, Lp // blk_l),
        in_specs=[
            pl.BlockSpec((blk_l, blk_b), lambda b, l: (l, b)),
            pl.BlockSpec((blk_l, blk_b), lambda b, l: (l, b)),
        ],
        out_specs=pl.BlockSpec((1, blk_b), lambda b, l: (0, b)),
        scratch_shapes=[pltpu.VMEM((1, blk_b), jnp.float32)],
        compiler_params=pltpu.CompilerParams(
            dimension_semantics=("parallel", "arbitrary"),
            vmem_limit_bytes=vmem_limit),
    )(xs, xts)

    # bias added outside the kernel (avoids a per-step (1,1) scalar VMEM tile)
    return out[0, :B].reshape(B, 1) + fm_bias.astype(jnp.float32)


def ffm_reference(feature_embeddings, weights_first_order, fm_bias,
                  feature_idx, feature_values):
    """Pure-JAX transcription of the PyTorch forward (correctness check)."""
    B, F = feature_idx.shape
    w = weights_first_order[feature_idx, 0]                          # (B, F)
    first = jnp.sum(feature_values * w, axis=1, keepdims=True)
    second = jnp.zeros((B, 1), jnp.float32)
    for i in range(F):
        for j in range(i + 1, F):
            vifj = feature_embeddings[feature_idx[:, i], j, :]
            vjfi = feature_embeddings[feature_idx[:, j], i, :]
            second = second + (jnp.sum(vifj * vjfi, axis=1, keepdims=True)
                               * feature_values[:, i:i + 1]
                               * feature_values[:, j:j + 1])
    return second + first + fm_bias


if __name__ == "__main__":
    # Synthetic sizes consistent with the module's __init__ params.
    feature_size, field_size, embedding_size = 32, 4, 8
    B = 16  # batch

    key = jax.random.PRNGKey(0)
    k_emb, k_w1, k_idx, k_val = jax.random.split(key, 4)

    feature_embeddings = jax.random.normal(
        k_emb, (feature_size, field_size, embedding_size), jnp.float32)
    weights_first_order = jax.random.normal(
        k_w1, (feature_size, 1), jnp.float32)
    fm_bias = jnp.zeros((1,), jnp.float32)

    feature_idx = jax.random.randint(
        k_idx, (B, field_size), 0, feature_size, dtype=jnp.int32)
    feature_values = jax.random.normal(k_val, (B, field_size), jnp.float32)

    ref = ffm_reference(feature_embeddings, weights_first_order, fm_bias,
                        feature_idx, feature_values)

    # f32-streamed path: bit-accurate check of the kernel semantics.
    logits_f32 = ffm_forward(feature_embeddings, weights_first_order, fm_bias,
                             feature_idx, feature_values,
                             stream_dtype=jnp.float32)
    logits_f32 = jax.block_until_ready(logits_f32)
    assert logits_f32.shape == (B, 1), logits_f32.shape
    assert jnp.allclose(logits_f32, ref, atol=1e-4, rtol=1e-4), (logits_f32, ref)

    # bf16-streamed path (default, bandwidth-optimized): looser tolerance.
    logits_bf16 = ffm_forward(feature_embeddings, weights_first_order, fm_bias,
                              feature_idx, feature_values)
    logits_bf16 = jax.block_until_ready(logits_bf16)
    assert logits_bf16.shape == (B, 1), logits_bf16.shape
    assert jnp.allclose(logits_bf16, ref, atol=0.25, rtol=0.1), (logits_bf16, ref)

    print("KERNEL_OK")
</pallas_src>

<mosaic_0001>
module attributes {stable_mosaic.version = 11 : i64} {
  func.func @ffm_kernel(%arg0: i32, %arg1: i32, %arg2: memref<56x128xf32, #tpu.memory_space<vmem>>, %arg3: memref<56x128xf32, #tpu.memory_space<vmem>>, %arg4: memref<1x128xf32, #tpu.memory_space<vmem>>, %arg5: memref<1x128xf32, #tpu.memory_space<vmem>>) attributes {dimension_semantics = [#tpu.dimension_semantics<parallel>, #tpu.dimension_semantics<arbitrary>], iteration_bounds = array<i64: 1, 1>, scalar_prefetch = 0 : i64, scratch_operands = 1 : i64, tpu.core_type = #tpu.core_type<tc>, window_params = [{transform_indices = @transform_0, window_bounds = array<i64: 56, 128>}, {transform_indices = @transform_1, window_bounds = array<i64: 56, 128>}, {transform_indices = @transform_2, window_bounds = array<i64: 1, 128>}]} {
    %c0_i32 = arith.constant 0 : i32
    %0 = arith.cmpi eq, %arg1, %c0_i32 : i32
    %1 = arith.extui %0 : i1 to i32
    %c0_i32_0 = arith.constant 0 : i32
    %2 = arith.cmpi ne, %1, %c0_i32_0 : i32
    scf.if %2 {
      %cst_10 = arith.constant 0.000000e+00 : f32
      %14 = vector.broadcast %cst_10 : f32 to vector<1x128xf32>
      %c0_11 = arith.constant 0 : index
      %c0_12 = arith.constant 0 : index
      %15 = vector.load %arg5[%c0_11, %c0_12] : memref<1x128xf32, #tpu.memory_space<vmem>>, vector<1x128xf32>
      tpu.vector_store %arg5[%c0_11, %c0_12], %14 {strides = array<i32>} : memref<1x128xf32, #tpu.memory_space<vmem>>, vector<1x128xf32>,
    } else {
    }
    %c0 = arith.constant 0 : index
    %c0_1 = arith.constant 0 : index
    %3 = vector.load %arg2[%c0, %c0_1] : memref<56x128xf32, #tpu.memory_space<vmem>>, vector<56x128xf32>
    %c0_2 = arith.constant 0 : index
    %c0_3 = arith.constant 0 : index
    %4 = vector.load %arg3[%c0_2, %c0_3] : memref<56x128xf32, #tpu.memory_space<vmem>>, vector<56x128xf32>
    %5 = arith.mulf %3, %4 : vector<56x128xf32>
    %c0_4 = arith.constant 0 : index
    %c0_5 = arith.constant 0 : index
    %6 = vector.load %arg5[%c0_4, %c0_5] : memref<1x128xf32, #tpu.memory_space<vmem>>, vector<1x128xf32>
    %cst = arith.constant dense<0.000000e+00> : vector<128xf32>
    %7 = vector.multi_reduction <add>, %5, %cst [0] : vector<56x128xf32> to vector<128xf32>
    %8 = vector.shape_cast %7 : vector<128xf32> to vector<1x128xf32>
    %9 = arith.addf %6, %8 : vector<1x128xf32>
    %c0_6 = arith.constant 0 : index
    %c0_7 = arith.constant 0 : index
    %10 = vector.load %arg5[%c0_6, %c0_7] : memref<1x128xf32, #tpu.memory_space<vmem>>, vector<1x128xf32>
    tpu.vector_store %arg5[%c0_6, %c0_7], %9 {strides = array<i32>} : memref<1x128xf32, #tpu.memory_space<vmem>>, vector<1x128xf32>,
    %c0_i32_8 = arith.constant 0 : i32
    %11 = arith.cmpi eq, %arg1, %c0_i32_8 : i32
    %12 = arith.extui %11 : i1 to i32
    %c0_i32_9 = arith.constant 0 : i32
    %13 = arith.cmpi ne, %12, %c0_i32_9 : i32
    scf.if %13 {
      %c0_10 = arith.constant 0 : index
      %c0_11 = arith.constant 0 : index
      %14 = vector.load %arg5[%c0_10, %c0_11] : memref<1x128xf32, #tpu.memory_space<vmem>>, vector<1x128xf32>
      %c0_12 = arith.constant 0 : index
      %c0_13 = arith.constant 0 : index
      %15 = vector.load %arg4[%c0_12, %c0_13] : memref<1x128xf32, #tpu.memory_space<vmem>>, vector<1x128xf32>
      tpu.vector_store %arg4[%c0_12, %c0_13], %14 {strides = array<i32>} : memref<1x128xf32, #tpu.memory_space<vmem>>, vector<1x128xf32>,
    } else {
    }
    return
  }
  func.func @transform_0(%arg0: i32, %arg1: i32) -> (i32, i32) {
    %c0_i32 = arith.constant 0 : i32
    return %arg1, %arg0 : i32, i32
  }
  func.func @transform_1(%arg0: i32, %arg1: i32) -> (i32, i32) {
    %c0_i32 = arith.constant 0 : i32
    return %arg1, %arg0 : i32, i32
  }
  func.func @transform_2(%arg0: i32, %arg1: i32) -> (i32, i32) {
    %c0_i32 = arith.constant 0 : i32
    %c0_i32_0 = arith.constant 0 : i32
    return %c0_i32, %arg0 : i32, i32
  }
}

</mosaic_0001>

<bundles_post_ra>
// kernel: tpu_custom_call.1
= control target key start
LH: loop header
LB: loop body
LE: loop exit
PB: predicated region body
PF: predicated region fallthrough
CT: control target
= control target key end

     0   :  { %7 = vsyncpa [#allocation4], 0  ;;  %s222_s0 = inlined_call_operand.hbm [shape: f32[56,128], index: 0, kind: input, shape index: {}]   ;;  %s223_s1 = inlined_call_operand.hbm [shape: f32[56,128], index: 1, kind: input, shape index: {}]   ;;  %s224_s2 = inlined_call_operand.hbm [shape: f32[1,128], index: 2, kind: output, shape index: {}]  }
   0x1   :  { %8 = vsyncpa [#allocation7], 0 }
   0x2   :  { %9 = vsyncpa [#allocation5], 0  ;;  %s14_s11 = sshll.u32 %s222_s0, 4  ;;  %s192_s12 = smov [#allocation3]   ;;  %s15_s11 = int_to_ptr.hbm [resolvable:$true] %s14_s11 }
   0x3   :  { %s16_s13 = sshll.u32 %s192_s12, 4  ;;  %s27_s16 = sshll.u32 %s223_s1, 4  ;;  %s17_s13 = int_to_ptr.vmem [resolvable:$true] %s16_s13  ;;  %s28_s16 = int_to_ptr.hbm [resolvable:$true] %s27_s16 }
   0x4   :  { %s193_s17 = smov 128   ;;  %s194_s18 = smov 8  }
   0x5   :  { %22 = dma.hbm_to_vmem [thread:$0]  %s15_s11, 896, %s17_s13, [#allocation4], %s193_s17, %s193_s17, %s194_s18  }
   0x6   :  { %s195_s19 = smov [#allocation6]  }
   0x7   :  { %s29_s20 = sshll.u32 %s195_s19, 4  ;;  %s30_s20 = int_to_ptr.vmem [resolvable:$true] %s29_s20 }
   0x8   :  { %35 = dma.hbm_to_vmem [thread:$0]  %s28_s16, 896, %s30_s20, [#allocation7], %s193_s17, %s193_s17, %s194_s18  }
   0x9   :  { %186 = dma.done.wait [#allocation4], 896  }
   0xa   :  { %187 = vsyncadd [#allocation4], 4294966400 }
   0xb   :  { %188 = dma.done.wait [#allocation7], 896  }
   0xc   :  { %189 = vsyncadd [#allocation7], 4294966400  ;;  %v196_v0 = vmov 0.0   ;;  %v49_v1 = vld [vmem:[#allocation3] sm:$0xff]  ;;  %v50_v2 = vld [vmem:[#allocation3 + $0x8] sm:$0xff]  ;;  %s197_s0 = smov [#allocation8]  }
   0xd   :  { %48 = vst [vmem:[#allocation2] sm:$0x1] %v196_v0  ;;  %v51_v3 = vld [vmem:[#allocation3 + $0x10] sm:$0xff]  ;;  %v52_v4 = vld [vmem:[#allocation3 + $0x18] sm:$0xff]  ;;  %v57_v6 = vld [vmem:[#allocation6 + $0x8] sm:$0xff]  ;;  %s95_s1 = sshll.u32 %s197_s0, 4  ;;  %s96_s1 = int_to_ptr.vmem [resolvable:$true] %s95_s1 }
   0xe   :  { %v56_v5 = vld [vmem:[#allocation6] sm:$0xff]  ;;  %v58_v7 = vld [vmem:[#allocation6 + $0x10] sm:$0xff]  ;;  %v59_v8 = vld [vmem:[#allocation6 + $0x18] sm:$0xff]  ;;  %v64_v10 = vmul.f32 %v57_v6, %v50_v2  ;;  %s97_s23 = sshll.u32 %s224_s2, 4  ;;  %s98_s23 = int_to_ptr.hbm [resolvable:$true] %s97_s23 }
   0xf   :  { %v63_v9 = vmul.f32 %v56_v5, %v49_v1  ;;  %v53_v11 = vld [vmem:[#allocation3 + $0x20] sm:$0xff]  ;;  %v60_v12 = vld [vmem:[#allocation6 + $0x20] sm:$0xff]  ;;  %v65_v13 = vmul.f32 %v58_v7, %v51_v3  ;;  %v66_v14 = vmul.f32 %v59_v8, %v52_v4  ;;  %v54_v16 = vld [vmem:[#allocation3 + $0x28] sm:$0xff] }
  0x10   :  { %v61_v17 = vld [vmem:[#allocation6 + $0x28] sm:$0xff]  ;;  %v67_v18 = vmul.f32 %v60_v12, %v53_v11  ;;  %v55_v20 = vld [vmem:[#allocation3 + $0x30] sm:$0xff]  ;;  %v62_v21 = vld [vmem:[#allocation6 + $0x30] sm:$0xff] }
  0x11   :  { %v71_v15 = vadd.f32 %v64_v10, %v63_v9  ;;  %v68_v22 = vmul.f32 %v61_v17, %v54_v16  ;;  %v69_v24 = vmul.f32 %v62_v21, %v55_v20 }
  0x13   :  { %v72_v19 = vadd.f32 %v71_v15, %v65_v13 }
  0x14   :  { %v70_v33 = vld [vmem:[#allocation2] sm:$0x1] }
  0x15   :  { %v73_v23 = vadd.f32 %v72_v19, %v66_v14 }
  0x17   :  { %v74_v25 = vadd.f32 %v73_v23, %v67_v18 }
  0x19   :  { %v75_v26 = vadd.f32 %v74_v25, %v68_v22 }
  0x1b   :  { %v76_v27 = vadd.f32 %v75_v26, %v69_v24 }
  0x1d   :  { %v77_v28 = vrot.slane %v76_v27, 4 }
  0x1f   :  { %v78_v29 = vadd.f32 %v77_v28, %v76_v27 }
  0x21   :  { %v79_v30 = vrot.slane %v78_v29, 2 }
  0x23   :  { %v80_v31 = vadd.f32 %v79_v30, %v78_v29 }
  0x25   :  { %v81_v32 = vrot.slane %v80_v31, 1 }
  0x27   :  { %v82_v34 = vadd.f32 %v81_v32, %v80_v31 }
  0x29   :  { %v83_v35 = vadd.f32 %v82_v34, %v70_v33 }
  0x2b   :  { %84 = vst [vmem:[#allocation2] sm:$0x1] %v83_v35 }
  0x32   :  { %v88_v36 = vld [vmem:[#allocation2] sm:$0x1] }
  0x33   :  { %89 = vst [vmem:[#allocation8] sm:$0x1] %v88_v36 }
  0x34   :  { %100 = dma.vmem_to_hbm [thread:$0]  %s96_s1, 16, %s98_s23, [#allocation5]  }
  0x35   :  { %190 = dma.done.wait [#allocation5], 16  }
  0x36   :  { %191 = vsyncadd [#allocation5], 4294967280 }
  0x37   :  { %105 = vsyncpa [#allocation4], 1 }
  0x38   :  { %106 = vsyncpa [#allocation7], 1 }
  0x39   :  { %107 = vsyncpa [#allocation5], 1 }

</bundles_post_ra>
